<compile_context>
chip_gen: v7x
topology: tpu7x:2x2x1
jax: 0.10.0
libtpu: 0.0.40
codegen_flags: <defaults>
</compile_context>

<pallas_src>
import jax
import jax.numpy as jnp
from jax import lax
from jax.experimental import pallas as pl
from jax.experimental.pallas import tpu as pltpu

LANE = 128


def _round_up(x, m):
    return ((x + m - 1) // m) * m


def _pad_to(a, shape):
    pads = [(0, t - s) for s, t in zip(a.shape, shape)]
    return jnp.pad(a, pads)


def _make_kernel(ci_p):
    """Build the tiled GroundTrans kernel (static Ci padding closed over)."""

    def kernel(xl_ref, pg_ref, w_th_ref, b_th_ref, w_z_ref, b_z_ref,
               out_ref, acc_ref, theta_ref):
        j = pl.program_id(2)

        @pl.when(j == 0)
        def _init():
            acc_ref[...] = jnp.zeros_like(acc_ref)
            # theta projection of the x_low tile (bf16 x bf16 -> f32 on the MXU).
            # The 1/Sh 'dot' normalization is already folded into w_theta / b_theta.
            th = jnp.dot(xl_ref[0], w_th_ref[...],
                         preferred_element_type=jnp.float32) + b_th_ref[...]
            theta_ref[...] = th.astype(theta_ref.dtype)

        # phi | g of the current Sh tile: precomputed once per call outside the kernel
        # (no per-Sl-tile recompute) and streamed here as bf16.  Padded Sh rows and padded
        # Ci lanes are exact zeros, so no masking is needed.
        pg = pg_ref[0]                  # (TILE_Sh, 2*Ci_p) bf16
        phi = pg[:, :ci_p]              # (TILE_Sh, Ci_p)
        g_x = pg[:, ci_p:]              # (TILE_Sh, Ci_p)

        # f_tile = theta @ phi^T (same contraction pattern as flash attention's q @ k^T).
        f = lax.dot_general(theta_ref[...], phi, (((1,), (1,)), ((), ())),
                            preferred_element_type=jnp.float32)       # (TILE_Sl, TILE_Sh)
        # y accumulation: the full (Sl, Sh) matrix is never materialized.
        acc_ref[...] += jnp.dot(f.astype(jnp.bfloat16), g_x,
                                preferred_element_type=jnp.float32)   # (TILE_Sl, Ci_p)

        @pl.when(j == pl.num_programs(2) - 1)
        def _epilogue():
            # W_z 1x1 conv with inference BatchNorm folded into the weights / bias.
            z = jnp.dot(acc_ref[...].astype(jnp.bfloat16), w_z_ref[...],
                        preferred_element_type=jnp.float32) + b_z_ref[...]
            out_ref[0] = z.astype(out_ref.dtype)

    return kernel


def _ground_trans_xla(x_low, x_high, p):
    """Plain-XLA f32 path (forward semantics of the module, mode='dot', inference BN)."""
    N, C, Hl, Wl = x_low.shape
    _, _, Hh, Wh = x_high.shape
    Sl, Sh = Hl * Wl, Hh * Wh
    xl = jnp.transpose(x_low, (0, 2, 3, 1)).reshape(N, Sl, C)
    xh = jnp.transpose(x_high, (0, 2, 3, 1)).reshape(N, Sh, C)
    theta = xl @ p["w_theta"] + p["b_theta"]
    phi = xh @ p["w_phi"] + p["b_phi"]
    g = xh @ p["w_g"] + p["b_g"]
    f = jnp.einsum("nld,nhd->nlh", theta, phi) / Sh
    y = jnp.einsum("nlh,nhd->nld", f, g)
    z = (y @ p["w_z"] + p["b_z"]) * p["bn_scale"] + p["bn_shift"]
    return jnp.transpose(z.reshape(N, Hl, Wl, C), (0, 3, 1, 2))


def ground_trans(x_low, x_high, params, *, max_tile_sl=512, max_tile_sh=512,
                 force_pallas=False):
    """x_low, x_high: NCHW float32.  Returns z in NCHW (same spatial as x_low)."""
    assert max_tile_sh % LANE == 0, "max_tile_sh must be a multiple of 128"
    assert max_tile_sl % 16 == 0, "max_tile_sl must be a multiple of 16"

    N, C, Hl, Wl = x_low.shape
    _, _, Hh, Wh = x_high.shape
    Sl, Sh = Hl * Wl, Hh * Wh
    Ci = params["w_theta"].shape[1]

    # Tiny channel counts: lane-padding to 128 would do >=4x redundant MXU / DMA work, and
    # fused XLA wins there on every TPU generation.
    if not force_pallas and C <= 32 and Ci <= 32:
        return _ground_trans_xla(x_low, x_high, params)

    # Lane-dense channel padding (zeros in padded channels contribute exactly nothing).
    C_p = _round_up(C, LANE)
    Ci_p = _round_up(Ci, LANE)

    # Spatial tiling.
    #  * tile_sh is the lane dim of the f tile and the K dim of f @ g -> multiple of 128.
    #  * tile_sl only needs bf16 sublane alignment (16).
    #  * On v5e, if enlarging max_tile_sh, check vst slot utilization first (single store slot;
    #    the f32 f tile round-trips VMEM).
    tile_sh = min(max_tile_sh, _round_up(Sh, LANE))
    tile_sl = min(max_tile_sl, _round_up(Sl, 16))
    if N == 1:
        # Feed both v7x TensorCores even when the batch axis alone can't.
        tile_sl = min(tile_sl, _round_up((Sl + 1) // 2, 16))
    Sl_p = _round_up(Sl, tile_sl)
    Sh_p = _round_up(Sh, tile_sh)
    n_sl = Sl_p // tile_sl
    n_sh = Sh_p // tile_sh

    # ---- one-time constant folding + bf16 casts (outside the hot path) ----
    f32 = jnp.float32
    inv_sh = f32(1.0 / Sh)                                  # mode='dot': f / N
    w_theta = _pad_to(params["w_theta"] * inv_sh, (C_p, Ci_p)).astype(jnp.bfloat16)
    b_theta = _pad_to(params["b_theta"] * inv_sh, (1, Ci_p)).astype(f32)
    # TODO(synk): only inference BatchNorm (running stats) is folded; training-mode batch
    # statistics are not implemented.
    w_z = _pad_to(params["w_z"] * params["bn_scale"], (Ci_p, C_p)).astype(jnp.bfloat16)
    b_z = _pad_to(params["b_z"] * params["bn_scale"] + params["bn_shift"],
                  (1, C_p)).astype(f32)

    # NCHW -> (N, S, C) channels-last.
    xl = jnp.transpose(x_low, (0, 2, 3, 1)).reshape(N, Sl, C)
    xh = jnp.transpose(x_high, (0, 2, 3, 1)).reshape(N, Sh, C)
    xl = _pad_to(xl, (N, Sl_p, C_p)).astype(jnp.bfloat16)

    # phi | g projection precomputed ONCE per call (plain XLA, bf16 x bf16 -> f32) instead of
    # once per Sl tile inside the kernel; stored bf16 and streamed tile-by-tile.  Zero-padding
    # along Sh and Ci keeps the padded rows/lanes exactly zero.
    w_pg = jnp.concatenate([_pad_to(params["w_phi"], (C, Ci_p)),
                            _pad_to(params["w_g"], (C, Ci_p))], axis=1).astype(jnp.bfloat16)
    b_pg = jnp.concatenate([_pad_to(params["b_phi"], (1, Ci_p)),
                            _pad_to(params["b_g"], (1, Ci_p))], axis=1).astype(f32)
    pg = jnp.einsum("nsc,ck->nsk", xh.astype(jnp.bfloat16), w_pg,
                    preferred_element_type=jnp.float32) + b_pg
    pg = _pad_to(pg.astype(jnp.bfloat16), (N, Sh_p, 2 * Ci_p))

    # VMEM budget: double-buffered data tiles + resident weights + scratch + f temporaries.
    bf, f4 = 2, 4
    est = (2 * tile_sl * C_p * bf                 # x_low tile (bf16), double-buffered
           + 2 * tile_sh * 2 * Ci_p * bf          # phi|g tile (bf16), double-buffered
           + 2 * tile_sl * C_p * f4               # output tile (f32), double-buffered
           + 2 * (C_p * Ci_p * bf + Ci_p * f4     # weights / biases (worst case double-buffered)
                  + Ci_p * C_p * bf + C_p * f4)
           + tile_sl * Ci_p * (f4 + bf)           # f32 accumulator + bf16 theta scratch
           + tile_sl * tile_sh * (f4 + bf))       # f tile (f32) + its bf16 copy
    try:
        phys_vmem = pltpu.get_tpu_info().vmem_capacity_bytes
    except Exception:
        phys_vmem = 64 * 2 ** 20                  # conservative (v7x per-TC VMEM)
    # Keep ~25% headroom for Mosaic internal scratch / spill: ~48 MiB cap on v7x (64 MiB
    # physical), ~96 MiB on v5e / v6e (128 MiB physical).
    vmem_cap = int(phys_vmem) * 3 // 4
    vmem_limit = int(min(vmem_cap, max(32 * 2 ** 20, 2 * est)))

    kern = _make_kernel(Ci_p)

    def const_spec(shape):
        return pl.BlockSpec(shape, lambda n, i, j: (0,) * len(shape))

    out = pl.pallas_call(
        kern,
        out_shape=jax.ShapeDtypeStruct((N, Sl_p, C_p), jnp.float32),
        grid_spec=pltpu.PrefetchScalarGridSpec(
            num_scalar_prefetch=0,
            grid=(N, n_sl, n_sh),
            in_specs=[
                pl.BlockSpec((1, tile_sl, C_p), lambda n, i, j: (n, i, 0)),       # x_low tile
                pl.BlockSpec((1, tile_sh, 2 * Ci_p), lambda n, i, j: (n, j, 0)),  # phi|g tile
                const_spec((C_p, Ci_p)), const_spec((1, Ci_p)),                   # theta (1/Sh folded)
                const_spec((Ci_p, C_p)), const_spec((1, C_p)),                    # W_z (BN folded)
            ],
            out_specs=pl.BlockSpec((1, tile_sl, C_p), lambda n, i, j: (n, i, 0)),
            scratch_shapes=[
                pltpu.VMEM((tile_sl, Ci_p), jnp.float32),    # y accumulator
                pltpu.VMEM((tile_sl, Ci_p), jnp.bfloat16),   # theta tile (reused across Sh steps)
            ],
        ),
        compiler_params=pltpu.CompilerParams(
            dimension_semantics=("parallel", "parallel", "arbitrary"),
            vmem_limit_bytes=vmem_limit,
        ),
    )(xl, pg, w_theta, b_theta, w_z, b_z)

    out = out[:, :Sl, :C]                                    # drop lane / sublane padding
    return jnp.transpose(out.reshape(N, Hl, Wl, C), (0, 3, 1, 2))


def make_params(key, in_channels, inter_channels):
    """Deterministic synthetic parameters (shapes per GroundTrans.__init__).

    Note: the PyTorch module zero-initializes the W_z BatchNorm gamma/beta (a freshly
    initialized module outputs all zeros).  Nonzero deterministic values are used here so the
    kernel math is actually exercised; the forward-pass semantics are identical.
    """
    ks = jax.random.split(key, 10)
    C, Ci = in_channels, inter_channels
    s = 0.1

    def w(k, shape):
        return s * jax.random.normal(k, shape, dtype=jnp.float32)

    # Conv2d(kernel_size=1) weights are (out, in, 1, 1) in PyTorch; stored pre-transposed (in, out).
    p = {
        "w_theta": w(ks[0], (C, Ci)), "b_theta": w(ks[1], (1, Ci)),
        "w_phi":   w(ks[2], (C, Ci)), "b_phi":   w(ks[3], (1, Ci)),
        "w_g":     w(ks[4], (C, Ci)), "b_g":     w(ks[5], (1, Ci)),
        "w_z":     w(ks[6], (Ci, C)), "b_z":     w(ks[7], (1, C)),
    }
    # BatchNorm2d (inference): folded per-channel scale/shift.
    gamma = 1.0 + w(ks[8], (1, C))
    beta = w(ks[9], (1, C))
    running_mean = jnp.zeros((1, C), jnp.float32)
    running_var = jnp.ones((1, C), jnp.float32)
    eps = 1e-5
    scale = gamma / jnp.sqrt(running_var + eps)
    shift = beta - running_mean * scale
    p["bn_scale"] = scale
    p["bn_shift"] = shift
    return p


def ground_trans_reference(x_low, x_high, p):
    """Pure-JAX f32 reference replicating the PyTorch forward (mode='dot')."""
    return _ground_trans_xla(x_low, x_high, p)


if __name__ == "__main__":
    key = jax.random.PRNGKey(0)
    k_low, k_high, k_params, k_low2, k_high2, k_params2 = jax.random.split(key, 6)
    batch = 2

    # ---- main test: lane-dense channels, Pallas path ----
    in_channels = 128
    inter_channels = in_channels // 2          # module default
    x_low = jax.random.normal(k_low, (batch, in_channels, 16, 16), dtype=jnp.float32)
    x_high = jax.random.normal(k_high, (batch, in_channels, 8, 8), dtype=jnp.float32)
    params = make_params(k_params, in_channels, inter_channels)

    z = jax.block_until_ready(ground_trans(x_low, x_high, params))
    z_ref = ground_trans_reference(x_low, x_high, params)
    assert z.shape == (batch, in_channels, 16, 16)
    # All matmuls run bf16 (f32 accumulation): compare with a scale-relative bound.
    err = jnp.max(jnp.abs(z - z_ref)) / (jnp.max(jnp.abs(z_ref)) + 1e-6)
    assert err < 5e-2, f"mismatch vs reference: rel err {err}"

    # ---- tiny-channel case: default routes to fused XLA; forced Pallas checks the padding path ----
    small_c, small_ci = 8, 4
    x_low_s = jax.random.normal(k_low2, (batch, small_c, 16, 16), dtype=jnp.float32)
    x_high_s = jax.random.normal(k_high2, (batch, small_c, 8, 8), dtype=jnp.float32)
    params_s = make_params(k_params2, small_c, small_ci)
    z_s_ref = ground_trans_reference(x_low_s, x_high_s, params_s)

    z_s_xla = jax.block_until_ready(ground_trans(x_low_s, x_high_s, params_s))
    assert z_s_xla.shape == (batch, small_c, 16, 16)
    assert jnp.allclose(z_s_xla, z_s_ref, atol=1e-4, rtol=1e-4), "XLA fallback mismatch"

    z_s_pal = jax.block_until_ready(
        ground_trans(x_low_s, x_high_s, params_s, force_pallas=True))
    err_s = jnp.max(jnp.abs(z_s_pal - z_s_ref)) / (jnp.max(jnp.abs(z_s_ref)) + 1e-6)
    assert err_s < 5e-2, f"padded-path mismatch vs reference: rel err {err_s}"

    print("KERNEL_OK")
</pallas_src>

<mosaic_0001>
module attributes {stable_mosaic.version = 11 : i64} {
  func.func @kernel(%arg0: i32, %arg1: i32, %arg2: i32, %arg3: memref<1x256x128xbf16, #tpu.memory_space<vmem>>, %arg4: memref<1x128x256xbf16, #tpu.memory_space<vmem>>, %arg5: memref<128x128xbf16, #tpu.memory_space<vmem>>, %arg6: memref<1x128xf32, #tpu.memory_space<vmem>>, %arg7: memref<128x128xbf16, #tpu.memory_space<vmem>>, %arg8: memref<1x128xf32, #tpu.memory_space<vmem>>, %arg9: memref<1x256x128xf32, #tpu.memory_space<vmem>>, %arg10: memref<256x128xf32, #tpu.memory_space<vmem>>, %arg11: memref<256x128xbf16, #tpu.memory_space<vmem>>) attributes {dimension_semantics = [#tpu.dimension_semantics<parallel>, #tpu.dimension_semantics<parallel>, #tpu.dimension_semantics<arbitrary>], iteration_bounds = array<i64: 2, 1, 1>, scalar_prefetch = 0 : i64, scratch_operands = 2 : i64, tpu.core_type = #tpu.core_type<tc>, window_params = [{transform_indices = @transform_0, window_bounds = array<i64: 1, 256, 128>}, {transform_indices = @transform_1, window_bounds = array<i64: 1, 128, 256>}, {pipeline_mode = #tpu.pipeline_mode<synchronous>, transform_indices = @transform_2, window_bounds = array<i64: 128, 128>}, {pipeline_mode = #tpu.pipeline_mode<synchronous>, transform_indices = @transform_3, window_bounds = array<i64: 1, 128>}, {pipeline_mode = #tpu.pipeline_mode<synchronous>, transform_indices = @transform_4, window_bounds = array<i64: 128, 128>}, {pipeline_mode = #tpu.pipeline_mode<synchronous>, transform_indices = @transform_5, window_bounds = array<i64: 1, 128>}, {transform_indices = @transform_6, window_bounds = array<i64: 1, 256, 128>}]} {
    %c0_i32 = arith.constant 0 : i32
    %0 = arith.cmpi eq, %arg2, %c0_i32 : i32
    %1 = arith.extui %0 : i1 to i32
    %c0_i32_0 = arith.constant 0 : i32
    %2 = arith.cmpi ne, %1, %c0_i32_0 : i32
    scf.if %2 {
      %cst_12 = arith.constant 0.000000e+00 : f32
      %17 = vector.broadcast %cst_12 : f32 to vector<256x128xf32>
      %c0_13 = arith.constant 0 : index
      %c0_14 = arith.constant 0 : index
      %18 = vector.load %arg10[%c0_13, %c0_14] : memref<256x128xf32, #tpu.memory_space<vmem>>, vector<256x128xf32>
      tpu.vector_store %arg10[%c0_13, %c0_14], %17 {strides = array<i32>} : memref<256x128xf32, #tpu.memory_space<vmem>>, vector<256x128xf32>,
      %c0_15 = arith.constant 0 : index
      %c0_16 = arith.constant 0 : index
      %c0_17 = arith.constant 0 : index
      %19 = vector.load %arg3[%c0_15, %c0_16, %c0_17] : memref<1x256x128xbf16, #tpu.memory_space<vmem>>, vector<1x256x128xbf16>
      %20 = vector.shape_cast %19 : vector<1x256x128xbf16> to vector<256x128xbf16>
      %c0_18 = arith.constant 0 : index
      %c0_19 = arith.constant 0 : index
      %21 = vector.load %arg5[%c0_18, %c0_19] : memref<128x128xbf16, #tpu.memory_space<vmem>>, vector<128x128xbf16>
      %cst_20 = arith.constant dense<0.000000e+00> : vector<256x128xf32>
      %22 = tpu.matmul %20, %21, %cst_20 {dimension_numbers = #tpu.dot_dimension_numbers<[1], [0], [0], [1], [0, 0, 1, 1], [], []>} : vector<256x128xbf16>, vector<128x128xbf16>, vector<256x128xf32> -> vector<256x128xf32>
      %c0_21 = arith.constant 0 : index
      %c0_22 = arith.constant 0 : index
      %23 = vector.load %arg6[%c0_21, %c0_22] : memref<1x128xf32, #tpu.memory_space<vmem>>, vector<1x128xf32>
      %24 = vector.broadcast %23 : vector<1x128xf32> to vector<256x128xf32>
      %25 = arith.addf %22, %24 : vector<256x128xf32>
      %26 = arith.truncf %25 : vector<256x128xf32> to vector<256x128xbf16>
      %c0_23 = arith.constant 0 : index
      %c0_24 = arith.constant 0 : index
      %27 = vector.load %arg11[%c0_23, %c0_24] : memref<256x128xbf16, #tpu.memory_space<vmem>>, vector<256x128xbf16>
      tpu.vector_store %arg11[%c0_23, %c0_24], %26 {strides = array<i32>} : memref<256x128xbf16, #tpu.memory_space<vmem>>, vector<256x128xbf16>,
    } else {
    }
    %c0 = arith.constant 0 : index
    %c0_1 = arith.constant 0 : index
    %c0_2 = arith.constant 0 : index
    %3 = vector.load %arg4[%c0, %c0_1, %c0_2] : memref<1x128x256xbf16, #tpu.memory_space<vmem>>, vector<1x128x256xbf16>
    %4 = vector.shape_cast %3 : vector<1x128x256xbf16> to vector<128x256xbf16>
    %5 = vector.extract_strided_slice %4 {offsets = [0, 0], sizes = [128, 128], strides = [1, 1]} : vector<128x256xbf16> to vector<128x128xbf16>
    %6 = vector.extract_strided_slice %4 {offsets = [0, 128], sizes = [128, 128], strides = [1, 1]} : vector<128x256xbf16> to vector<128x128xbf16>
    %c0_3 = arith.constant 0 : index
    %c0_4 = arith.constant 0 : index
    %7 = vector.load %arg11[%c0_3, %c0_4] : memref<256x128xbf16, #tpu.memory_space<vmem>>, vector<256x128xbf16>
    %cst = arith.constant dense<0.000000e+00> : vector<256x128xf32>
    %8 = tpu.matmul %7, %5, %cst {dimension_numbers = #tpu.dot_dimension_numbers<[1], [1], [0], [0], [0, 0, 1, 0], [], []>} : vector<256x128xbf16>, vector<128x128xbf16>, vector<256x128xf32> -> vector<256x128xf32>
    %c0_5 = arith.constant 0 : index
    %c0_6 = arith.constant 0 : index
    %9 = vector.load %arg10[%c0_5, %c0_6] : memref<256x128xf32, #tpu.memory_space<vmem>>, vector<256x128xf32>
    %10 = arith.truncf %8 : vector<256x128xf32> to vector<256x128xbf16>
    %cst_7 = arith.constant dense<0.000000e+00> : vector<256x128xf32>
    %11 = tpu.matmul %10, %6, %cst_7 {dimension_numbers = #tpu.dot_dimension_numbers<[1], [0], [0], [1], [0, 0, 1, 1], [], []>} : vector<256x128xbf16>, vector<128x128xbf16>, vector<256x128xf32> -> vector<256x128xf32>
    %12 = arith.addf %9, %11 : vector<256x128xf32>
    %c0_8 = arith.constant 0 : index
    %c0_9 = arith.constant 0 : index
    %13 = vector.load %arg10[%c0_8, %c0_9] : memref<256x128xf32, #tpu.memory_space<vmem>>, vector<256x128xf32>
    tpu.vector_store %arg10[%c0_8, %c0_9], %12 {strides = array<i32>} : memref<256x128xf32, #tpu.memory_space<vmem>>, vector<256x128xf32>,
    %c0_i32_10 = arith.constant 0 : i32
    %14 = arith.cmpi eq, %arg2, %c0_i32_10 : i32
    %15 = arith.extui %14 : i1 to i32
    %c0_i32_11 = arith.constant 0 : i32
    %16 = arith.cmpi ne, %15, %c0_i32_11 : i32
    scf.if %16 {
      %c0_12 = arith.constant 0 : index
      %c0_13 = arith.constant 0 : index
      %17 = vector.load %arg10[%c0_12, %c0_13] : memref<256x128xf32, #tpu.memory_space<vmem>>, vector<256x128xf32>
      %18 = arith.truncf %17 : vector<256x128xf32> to vector<256x128xbf16>
      %c0_14 = arith.constant 0 : index
      %c0_15 = arith.constant 0 : index
      %19 = vector.load %arg7[%c0_14, %c0_15] : memref<128x128xbf16, #tpu.memory_space<vmem>>, vector<128x128xbf16>
      %cst_16 = arith.constant dense<0.000000e+00> : vector<256x128xf32>
      %20 = tpu.matmul %18, %19, %cst_16 {dimension_numbers = #tpu.dot_dimension_numbers<[1], [0], [0], [1], [0, 0, 1, 1], [], []>} : vector<256x128xbf16>, vector<128x128xbf16>, vector<256x128xf32> -> vector<256x128xf32>
      %c0_17 = arith.constant 0 : index
      %c0_18 = arith.constant 0 : index
      %21 = vector.load %arg8[%c0_17, %c0_18] : memref<1x128xf32, #tpu.memory_space<vmem>>, vector<1x128xf32>
      %22 = vector.broadcast %21 : vector<1x128xf32> to vector<256x128xf32>
      %23 = arith.addf %20, %22 : vector<256x128xf32>
      %c0_19 = arith.constant 0 : index
      %c0_20 = arith.constant 0 : index
      %c0_21 = arith.constant 0 : index
      %24 = vector.load %arg9[%c0_19, %c0_20, %c0_21] : memref<1x256x128xf32, #tpu.memory_space<vmem>>, vector<1x256x128xf32>
      %25 = vector.shape_cast %24 : vector<1x256x128xf32> to vector<256x128xf32>
      %26 = vector.shape_cast %23 : vector<256x128xf32> to vector<1x256x128xf32>
      tpu.vector_store %arg9[%c0_19, %c0_20, %c0_21], %26 {strides = array<i32>} : memref<1x256x128xf32, #tpu.memory_space<vmem>>, vector<1x256x128xf32>,
    } else {
    }
    return
  }
  func.func @transform_0(%arg0: i32, %arg1: i32, %arg2: i32) -> (i32, i32, i32) {
    %c0_i32 = arith.constant 0 : i32
    %c0_i32_0 = arith.constant 0 : i32
    return %arg0, %arg1, %c0_i32 : i32, i32, i32
  }
  func.func @transform_1(%arg0: i32, %arg1: i32, %arg2: i32) -> (i32, i32, i32) {
    %c0_i32 = arith.constant 0 : i32
    %c0_i32_0 = arith.constant 0 : i32
    return %arg0, %arg2, %c0_i32 : i32, i32, i32
  }
  func.func @transform_2(%arg0: i32, %arg1: i32, %arg2: i32) -> (i32, i32) {
    %c0_i32 = arith.constant 0 : i32
    %c0_i32_0 = arith.constant 0 : i32
    %c0_i32_1 = arith.constant 0 : i32
    return %c0_i32, %c0_i32_0 : i32, i32
  }
  func.func @transform_3(%arg0: i32, %arg1: i32, %arg2: i32) -> (i32, i32) {
    %c0_i32 = arith.constant 0 : i32
    %c0_i32_0 = arith.constant 0 : i32
    %c0_i32_1 = arith.constant 0 : i32
    return %c0_i32, %c0_i32_0 : i32, i32
  }
  func.func @transform_4(%arg0: i32, %arg1: i32, %arg2: i32) -> (i32, i32) {
    %c0_i32 = arith.constant 0 : i32
    %c0_i32_0 = arith.constant 0 : i32
    %c0_i32_1 = arith.constant 0 : i32
    return %c0_i32, %c0_i32_0 : i32, i32
  }
  func.func @transform_5(%arg0: i32, %arg1: i32, %arg2: i32) -> (i32, i32) {
    %c0_i32 = arith.constant 0 : i32
    %c0_i32_0 = arith.constant 0 : i32
    %c0_i32_1 = arith.constant 0 : i32
    return %c0_i32, %c0_i32_0 : i32, i32
  }
  func.func @transform_6(%arg0: i32, %arg1: i32, %arg2: i32) -> (i32, i32, i32) {
    %c0_i32 = arith.constant 0 : i32
    %c0_i32_0 = arith.constant 0 : i32
    return %arg0, %arg1, %c0_i32 : i32, i32, i32
  }
}

</mosaic_0001>

<bundles_post_ra>
// kernel: tpu_custom_call.1
= control target key start
LH: loop header
LB: loop body
LE: loop exit
PB: predicated region body
PF: predicated region fallthrough
CT: control target
= control target key end

     0   :  { %s3054_s0 = inlined_call_operand.hbm [shape: bf16[2,256,128], index: 0, kind: input, shape index: {}]   ;;  %s3055_s1 = inlined_call_operand.hbm [shape: bf16[2,128,256], index: 1, kind: input, shape index: {}]   ;;  %s3056_s2 = inlined_call_operand.hbm [shape: bf16[128,128], index: 2, kind: input, shape index: {}]   ;;  %s3057_s3 = inlined_call_operand.vmem [shape: f32[1,128], index: 3, kind: input, shape index: {}]   ;;  %s3058_s4 = inlined_call_operand.hbm [shape: bf16[128,128], index: 4, kind: input, shape index: {}]   ;;  %s3059_s5 = inlined_call_operand.vmem [shape: f32[1,128], index: 5, kind: input, shape index: {}]   ;;  %s3060_s6 = inlined_call_operand.hbm [shape: f32[2,256,128], index: 6, kind: output, shape index: {}]  }
   0x1   :  { %3069 = sst [smem:[#allocation22_spill]] %s3054_s0 }
   0x2   :  { %3070 = sst [smem:[#allocation23_spill]] %s3056_s2 }
   0x3   :  { %3071 = sst [smem:[#allocation24_spill]] %s3058_s4 }
   0x4   :  { %11 = vsyncpa [#allocation5], 0 }
   0x5   :  { %13 = vsyncpa [#allocation5 + $0x1], 0 }
   0x6   :  { %14 = vsyncpa [#allocation8], 0 }
   0x7   :  { %16 = vsyncpa [#allocation8 + $0x1], 0 }
   0x8   :  { %17 = vsyncpa [#allocation11], 0 }
   0x9   :  { %18 = vsyncpa [#allocation6], 0 }
   0xa   :  { %20 = vsyncpa [#allocation6 + $0x1], 0  ;;  %s2601_s21 = smov 0   ;;  %s2603_s22 = smov 0  }
   0xb   :  { %s2605_s23 = smov 0   ;;  %s2607_s24 = smov 0  }
   0xc   :  { %s2609_s25 = smov 0   ;;  %s2611_s26 = smov 0  }
   0xd LB: > { %3072 = sst [smem:[#allocation18_spill]] %s2541_s23  ;;  %s2632_s27 = sadd.s32 4294967295, %s2553_s26   ;;  %s2553_s26 = sphi %s2611_s26, %s26_s26   ;;  %s2549_s25 = sphi %s2609_s25, %s3099_s25   ;;  %s2545_s24 = sphi %s2607_s24, %s3098_s24   ;;  %s2541_s23 = sphi %s2605_s23, %s3097_s23   ;;  %s2537_s22 = sphi %s2603_s22, %s3101_s22   ;;  %s2533_s21 = sphi %s2601_s21, %s3100_s21  }
   0xe   : > { %3073 = sst [smem:[#allocation19_spill]] %s2549_s25  ;;  %s1814_s28 = sadd.s32 4294967294, %s2553_s26  }
   0xf   : > { %p67_p0 = scmp.ne.s32.totalorder %s2537_s22, %s2533_s21  ;;  %p3061_p1 = scmp.eq.s32.totalorder %s2632_s27, 0 }
  0x10   : > { %p211_p3 = scmp.eq.s32.totalorder %s1814_s28, 1  ;;  %p1815_p5 = scmp.ge.s32.totalorder %s2553_s26, 1 }
  0x11   : > { %p2641_p4 = por %p3061_p1, %p67_p0  ;;  %p218_p7 = scmp.lt.s32.totalorder %s2553_s26, 3 }
  0x12   : > { %p2646_p6 = por %p211_p3, %p67_p0  ;;  %s2555_s8 = smov [#allocation9]  }
  0x13   : > { %s3074_s29 = scalar_select %p2641_p4, 1, 0 }
  0x14   : > { %s3075_s30 = scalar_select %p2646_p6, 1, 0 }
  0x15   : > { %p2651_p8 = pnand %p1815_p5, %p218_p7  ;;  %s230_s9 = sshll.u32 %s2555_s8, 4  ;;  %s2655_s9 = int_to_ptr.vmem [resolvable:$true] %s230_s9 }
  0x16   : > { %s2556_s11 = smov [#allocation10]   ;;  %s3078_s2 = sld [smem:[#allocation23_spill]] }
  0x17   : > { %p2207_p9 = pneg %p2651_p8  ;;  %s246_s12 = sshll.u32 %s2556_s11, 4  ;;  %s2666_s12 = int_to_ptr.vmem [resolvable:$true] %s246_s12 }
  0x19   : > { %p2662_p11 = pnand %p2207_p9, %p3061_p1 }
  0x1b   : > { %p2345_p13 = pneg %p2662_p11 }
  0x1c   : > { %s2343_s15 = scalar_lea.hbm %s3078_s2, 1024 }
  0x1d   : > { %p2344_p12 = scmp.ne.s32.totalorder %s3078_s2, %s2343_s15  ;;  %p2350_p5 = scmp.lt.u32.totalorder %s2343_s15, %s3078_s2 }
  0x1f   : > { %p2346_p0 = pnand %p2345_p13, %p2344_p12 }
  0x21   : > { %p2347_p3 = pneg %p2346_p0 }
  0x23   : > { %p2352_p7 = pnand %p2350_p5, %p2347_p3 }
  0x25   : > { %2355 = shalt.err (!%p2352_p7)
}
  0x26   : > { %s2356_s20 = scalar_lea.vmem %s2655_s9, 1024  ;;  %p2364_p2 = scmp.lt.s32.totalorder %s2655_s9, %s2655_s9 }
  0x27   : > { %p2357_p9 = scmp.ne.s32.totalorder %s2655_s9, %s2356_s20  ;;  %p2365_p12 = scmp.lt.s32.totalorder %s2356_s20, %s2356_s20 }
  0x29   : > { %p2359_p10 = pnand %p2357_p9, %p2345_p13  ;;  %p2366_p0 = por %p2365_p12, %p2364_p2 }
  0x2b   : > { %p2360_p1 = pneg %p2359_p10 }
  0x2d   : > { %p2367_p6 = pnand %p2366_p0, %p2360_p1 }
  0x2f   : > { %2370 = shalt.err (!%p2367_p6)
}
  0x30   : > { %s3062_s28 = smov 64   ;;  %s3063_s8 = smov 4  }
  0x31   : > { %2210 = dma.hbm_to_vmem [thread:$0]  (!%p2662_p11), %s3078_s2, 1024, %s2655_s9, [#allocation8], %s3062_s28, %s3062_s28, %s3063_s8  }
  0x32   : > { %s3079_s4 = sld [smem:[#allocation24_spill]] }
  0x38   : > { %s2371_s16 = scalar_lea.hbm %s3079_s4, 1024 }
  0x39   : > { %p2372_p1 = scmp.ne.s32.totalorder %s3079_s4, %s2371_s16  ;;  %p2378_p10 = scmp.lt.u32.totalorder %s2371_s16, %s3079_s4 }
  0x3b   : > { %p2374_p2 = pnand %p2372_p1, %p2345_p13 }
  0x3d   : > { %p2375_p6 = pneg %p2374_p2 }
  0x3f   : > { %p2380_p3 = pnand %p2378_p10, %p2375_p6 }
  0x41   : > { %2383 = shalt.err (!%p2380_p3)
}
  0x42   : > { %s2384_s9 = scalar_lea.vmem %s2666_s12, 1024  ;;  %p2392_p12 = scmp.lt.s32.totalorder %s2666_s12, %s2666_s12 }
  0x43   : > { %p2385_p5 = scmp.ne.s32.totalorder %s2666_s12, %s2384_s9  ;;  %p2393_p0 = scmp.lt.s32.totalorder %s2384_s9, %s2384_s9 }
  0x45   : > { %p2387_p7 = pnand %p2385_p5, %p2345_p13  ;;  %p2394_p1 = por %p2393_p0, %p2392_p12 }
  0x47   : > { %p2388_p9 = pneg %p2387_p7 }
  0x49   : > { %p2395_p2 = pnand %p2394_p1, %p2388_p9 }
  0x4b   : > { %2398 = shalt.err (!%p2395_p2)
}
  0x4c   : > { %2213 = dma.hbm_to_vmem [thread:$0]  (!%p2662_p11), %s3079_s4, 1024, %s2666_s12, [#allocation11], %s3062_s28, %s3062_s28, %s3063_s8  }
  0x4d   : > { %s45_s10 = sadd.s32 1, %s2549_s25  ;;  %s54_s14 = sadd.s32 1, %s2541_s23 }
  0x4e   : > { %p47_p13 = scmp.ge.s32.totalorder %s45_s10, 2  ;;  %p61_p6 = scmp.ne.s32.totalorder %s2541_s23, %s2537_s22 }
  0x4f   : > { %p62_p10 = scmp.eq.s32.totalorder %s2553_s26, 0  ;;  %p2227_p3 = scmp.lt.s32.totalorder %s2553_s26, 2 }
  0x50   : > { %s3103_s10 = smov (%p47_p13, %s45_s10), 0  ;;  %p3081_p7 = scmp.eq.s32.totalorder %s2632_s27, 1 }
  0x51   : > { %3080 = sst [smem:[#allocation20_spill]] %s3103_s10  ;;  %p63_p5 = por %p62_p10, %p61_p6 }
  0x52   : > { %p2736_p9 = por %p3081_p7, %p61_p6  ;;  %s49_s16 = ssub.s32 %s2549_s25, %s3103_s10 }
  0x53   : > { %s263_s17 = sand.u32 1, %s2541_s23   ;;  %p52_p12 = scmp.eq.s32.totalorder %s49_s16, 0 }
  0x54   : > { %s3082_s15 = scalar_select %p2736_p9, 1, 0 }
  0x55   : > { %s2743_s12 = sshll.u32 %s263_s17, 7  ;;  %s1886_s18 = sshll.u32 %s2549_s25, 11 }
  0x56   : > { %s2747_s19 = scalar_select %p52_p12, %s2541_s23, %s54_s14  }
  0x57   : > { %s3084_s0 = sld [smem:[#allocation22_spill]]  ;;  %s267_s13 = scalar_lea.vmem [#allocation4], %s2743_s12 }
  0x58   : > { %3083 = sst [smem:[#allocation21_spill]] %s2747_s19  ;;  %s276_s28 = sshll.u32 %s267_s13, 4  ;;  %s2761_s28 = int_to_ptr.vmem [resolvable:$true] %s276_s28 }
  0x59   : > { %p2757_p11 = pnand %p2227_p3, %p63_p5  ;;  %s2766_s20 = scalar_lea.hbm %s3055_s1, %s1886_s18 }
  0x5a   : > { %s2768_s9 = scalar_lea.sflag [#allocation5], %s263_s17 }
  0x5b   : > { %p2401_p1 = pneg %p2757_p11 }
  0x5d   : > { %s2752_s11 = scalar_lea.hbm %s3084_s0, %s1886_s18  ;;  %s2404_s10 = scalar_lea.hbm %s3084_s0, 4096 }
  0x5e   : > { %s2399_s2 = scalar_lea.hbm %s2752_s11, 2048  ;;  %p2405_p6 = scmp.lt.u32.totalorder %s2752_s11, %s3084_s0 }
  0x5f   : > { %p2400_p0 = scmp.ne.s32.totalorder %s2752_s11, %s2399_s2  ;;  %p2406_p10 = scmp.lt.u32.totalorder %s2404_s10, %s2399_s2 }
  0x60   : > { %p2408_p5 = scmp.lt.u32.totalorder %s2399_s2, %s2752_s11 }
  0x61   : > { %p2402_p2 = pnand %p2401_p1, %p2400_p0  ;;  %p2407_p3 = por %p2406_p10, %p2405_p6 }
  0x63   : > { %p2403_p13 = pneg %p2402_p2  ;;  %p2409_p7 = por %p2408_p5, %p2407_p3 }
  0x65   : > { %p2410_p12 = pnand %p2409_p7, %p2403_p13 }
  0x67   : > { %2413 = shalt.err (!%p2410_p12)
}
  0x68   : > { %s2414_s8 = scalar_lea.vmem %s2761_s28, 2048  ;;  %s2559_s4 = smov [#allocation4]  }
  0x69   : > { %p2415_p0 = scmp.ne.s32.totalorder %s2761_s28, %s2414_s8  ;;  %s2419_s17 = sshll.u32 %s2559_s4, 4  ;;  %s2420_s17 = int_to_ptr.vmem [resolvable:$false] %s2419_s17 }
  0x6a   : > { %s2421_s25 = scalar_lea.vmem %s2420_s17, 4096  ;;  %p2422_p4 = scmp.lt.s32.totalorder %s2761_s28, %s2420_s17 }
  0x6b   : > { %p2417_p2 = pnand %p2415_p0, %p2401_p1  ;;  %p2423_p6 = scmp.lt.s32.totalorder %s2421_s25, %s2414_s8 }
  0x6d   : > { %p2418_p9 = pneg %p2417_p2  ;;  %p2424_p10 = por %p2423_p6, %p2422_p4 }
  0x6f   : > { %p2425_p3 = pnand %p2424_p10, %p2418_p9 }
  0x71   : > { %2428 = shalt.err (!%p2425_p3)
}
  0x72   : > { %s3086_s2 = smov 4   ;;  %s3087_s10 = smov 64  }
  0x73   : > { %2217 = dma.hbm_to_vmem [thread:$0]  (!%p2757_p11), %s2752_s11, 2048, %s2761_s28, %s2768_s9, %s3087_s10, %s3087_s10, %s3086_s2  }
  0x74   : > { %s290_s18 = scalar_lea.vmem [#allocation7], %s2743_s12  ;;  %s286_s14 = sand.u32 1, %s2553_s26  }
  0x75   : > { %s300_s19 = sshll.u32 %s290_s18, 4  ;;  %s2803_s13 = scalar_lea.sflag [#allocation8], %s286_s14  ;;  %s2801_s19 = int_to_ptr.vmem [resolvable:$true] %s300_s19 }
  0x76   : > { %s2429_s8 = scalar_lea.hbm %s2766_s20, 2048  ;;  %s2434_s25 = scalar_lea.hbm %s3055_s1, 4096 }
  0x77   : > { %p2430_p4 = scmp.ne.s32.totalorder %s2766_s20, %s2429_s8  ;;  %p2435_p5 = scmp.lt.u32.totalorder %s2766_s20, %s3055_s1 }
  0x78   : > { %p2436_p7 = scmp.lt.u32.totalorder %s2434_s25, %s2429_s8  ;;  %p2438_p0 = scmp.lt.u32.totalorder %s2429_s8, %s2766_s20 }
  0x79   : > { %p2432_p9 = pnand %p2430_p4, %p2401_p1 }
  0x7a   : > { %p2437_p12 = por %p2436_p7, %p2435_p5 }
  0x7b   : > { %p2433_p13 = pneg %p2432_p9 }
  0x7c   : > { %p2439_p2 = por %p2438_p0, %p2437_p12 }
  0x7e   : > { %p2440_p6 = pnand %p2439_p2, %p2433_p13 }
  0x80   : > { %2443 = shalt.err (!%p2440_p6)
}
  0x81   : > { %s2444_s28 = scalar_lea.vmem %s2801_s19, 2048  ;;  %s2560_s12 = smov [#allocation7]  }
  0x82   : > { %p2445_p10 = scmp.ne.s32.totalorder %s2801_s19, %s2444_s28  ;;  %s2449_s11 = sshll.u32 %s2560_s12, 4  ;;  %s2450_s11 = int_to_ptr.vmem [resolvable:$false] %s2449_s11 }
  0x83   : > { %s2451_s0 = scalar_lea.vmem %s2450_s11, 4096  ;;  %p2452_p9 = scmp.lt.s32.totalorder %s2801_s19, %s2450_s11 }
  0x84   : > { %p2447_p3 = pnand %p2445_p10, %p2401_p1  ;;  %p2453_p5 = scmp.lt.s32.totalorder %s2451_s0, %s2444_s28 }
  0x86   : > { %p2448_p4 = pneg %p2447_p3  ;;  %p2454_p7 = por %p2453_p5, %p2452_p9 }
  0x88   : > { %p2455_p12 = pnand %p2454_p7, %p2448_p4 }
  0x8a   : > { %2458 = shalt.err (!%p2455_p12)
}
  0x8b   : > { %s2561_s23 = smov 128   ;;  %s2562_s9 = smov 8  }
  0x8c   : > { %2220 = dma.hbm_to_vmem [thread:$0]  (!%p2757_p11), %s2766_s20, 2048, %s2801_s19, %s2803_s13, %s2561_s23, %s2561_s23, %s2562_s9  }
  0x8d   : > { %312 = sbr.rel (%p2651_p8) target bundleno = 1135 (0x46f), region = 44  ;;  %s2832_s2 = sand.u32 (!%p2651_p8), 1, %s2537_s22  }
  0x8e   : > { %s1826_s10 = sshll.u32 (!%p2651_p8), %s2832_s2, 7  ;;  %s315_s18 = scalar_lea.sflag (!%p2651_p8), [#allocation5], %s2832_s2 }
  0x8f   : > { %s2836_s14 = scalar_lea.vmem (!%p2651_p8), [#allocation4], %s1826_s10  ;;  %p3088_p1 = scmp.ne.s32.totalorder (!%p2651_p8), %s3074_s29, 0 }
  0x94   : > { %2512 = dma.done.wait (%p3088_p1), %s315_s18, 2048  }
  0x95   : > { %2514 = vsyncadd (%p3088_p1), %s315_s18, 4294965248  ;;  %s323_s16 = sand.u32 1, %s2632_s27   ;;  %s2843_s20 = scalar_lea.vmem [#allocation7], %s1826_s10 }
  0x96   : > { %s324_s7 = scalar_lea.sflag [#allocation8], %s323_s16 }
  0x97   : > { %2516 = dma.done.wait (%p3088_p1), %s324_s7, 2048  }
  0x98   : > { %2518 = vsyncadd (%p3088_p1), %s324_s7, 4294965248  ;;  %p3089_p8 = scmp.eq.s32.totalorder %s2632_s27, 0 }
  0x9a   : > { %2520 = dma.done.wait (%p3089_p8), [#allocation8], 1024   ;;  %p3090_p11 = pmov %p3089_p8 }
  0x9b   : > { %p3091_p13 = pmov %p3089_p8 }
  0x9c   : > { %2522 = vsyncadd (%p3090_p11), [#allocation8], 4294966272 }
  0x9d   : > { %2524 = dma.done.wait (%p3091_p13), [#allocation11], 1024   ;;  %p3092_p0 = pmov %p3089_p8 }
  0x9e   : > { %v2287_v0 = vld [vmem:[#allocation9] sm:$0xff]   ;;  %v2288_v1 = vld [vmem:[#allocation9 + $0x8] sm:$0xff]   ;;  %v2289_v2 = vld [vmem:[#allocation9 + $0x10] sm:$0xff]   ;;  %s1830_s19 = sshll.u32 %s2832_s2, 8  ;;  %s1888_s17 = sshll.u32 %s2545_s24, 12 }
  0x9f   : > { %2526 = vsyncadd (%p3092_p0), [#allocation11], 4294966272  ;;  %1985 = vmatprep.subr.bf16.mxu0 %v2287_v0  ;;  %v2290_v3 = vld [vmem:[#allocation9 + $0x18] sm:$0xff]   ;;  %v2295_v4 = vld [vmem:[%s2836_s14] sm:$0xff]   ;;  %s2934_s4 = scalar_lea.vmem [#allocation12], %s1830_s19  ;;  %s2999_s11 = scalar_lea.hbm %s3060_s6, %s1888_s17 }
  0xa0   : > { %1986 = vmatpush3.bf16.msra.mxu0 %v2287_v0  ;;  %2001 = vmatprep.mubr.bf16.mxu0 %v2295_v4  ;;  %v2291_v5 = vld [vmem:[#allocation9 + $0x20] sm:$0xff]   ;;  %v2292_v6 = vld [vmem:[#allocation9 + $0x28] sm:$0xff]   ;;  %v2293_v7 = vld [vmem:[#allocation9 + $0x30] sm:$0xff]   ;;  %s1678_s25 = sshll.u32 %s2934_s4, 4  ;;  %s1663_s24 = scalar_lea.sflag [#allocation6], %s2832_s2  ;;  %s3001_s25 = int_to_ptr.vmem [resolvable:$true] %s1678_s25 }
  0xa1   : > { %1987 = vmatprep.subr.bf16.mxu0 %v2288_v1  ;;  %v2294_v8 = vld [vmem:[#allocation9 + $0x38] sm:$0xff]   ;;  %v2311_v9 = vld [vmem:[%s2843_s20] ss:$8 sps:$4 sm:$0xff]   ;;  %v2313_v11 = vld [vmem:[%s2843_s20 + $0x4] ss:$8 sps:$4 sm:$0xff]   ;;  %s2459_s0 = scalar_lea.vmem %s3001_s25, 4096 }
  0xa2   : > { %2033 = vmatprep.subr.bf16.mxu1 %v2311_v9  ;;  %v2314_v10 = vld [vmem:[%s2843_s20 + $0x10] ss:$8 sps:$4 sm:$0xff]   ;;  %v2296_v12 = vld [vmem:[%s2836_s14 + $0x8] sm:$0xff]   ;;  %v2299_v16 = vld [vmem:[%s2836_s14 + $0x20] sm:$0xff]   ;;  %p2460_p2 = scmp.ne.s32.totalorder %s3001_s25, %s2459_s0  ;;  %p3093_p6 = scmp.ne.s32.totalorder %s3082_s15, 0 }
  0xa3   : > { %2034 = vmatpush3.bf16.xpose.msra.mxu1 %v2311_v9  ;;  %v2297_v13 = vld [vmem:[%s2836_s14 + $0x10] sm:$0xff]   ;;  %v2316_v14 = vld [vmem:[%s2843_s20 + $0x20] ss:$8 sps:$4 sm:$0xff]   ;;  %v2298_v15 = vld [vmem:[%s2836_s14 + $0x18] sm:$0xff]   ;;  %s2563_s23 = smov [#allocation12]  }
  0xa4   : > { %1988 = vmatpush3.bf16.msra.mxu0 %v2288_v1  ;;  %2035 = vmatprep.subr.bf16.mxu1 %v2314_v10  ;;  %v2318_v17 = vld [vmem:[%s2843_s20 + $0x30] ss:$8 sps:$4 sm:$0xff]   ;;  %v2300_v18 = vld [vmem:[%s2836_s14 + $0x28] sm:$0xff]   ;;  %v2303_v22 = vld [vmem:[%s2836_s14 + $0x40] sm:$0xff]   ;;  %p2461_p10 = pnand %p2460_p2, %p3093_p6  ;;  %s2463_s9 = sshll.u32 %s2563_s23, 4  ;;  %s2464_s9 = int_to_ptr.vmem [resolvable:$false] %s2463_s9 }
  0xa5   : > { %1989 = vmatprep.subr.bf16.mxu0 %v2289_v2  ;;  %v2301_v19 = vld [vmem:[%s2836_s14 + $0x30] sm:$0xff]   ;;  %v2320_v20 = vld [vmem:[%s2843_s20 + $0x40] ss:$8 sps:$4 sm:$0xff]   ;;  %v2302_v21 = vld [vmem:[%s2836_s14 + $0x38] sm:$0xff]   ;;  %s2465_s10 = scalar_lea.vmem %s2464_s9, 8192  ;;  %p2466_p4 = scmp.lt.s32.totalorder %s3001_s25, %s2464_s9 }
  0xa6   : > { %v2322_v23 = vld [vmem:[%s2843_s20 + $0x50] ss:$8 sps:$4 sm:$0xff]   ;;  %v2304_v24 = vld [vmem:[%s2836_s14 + $0x48] sm:$0xff]   ;;  %v2307_v28 = vld [vmem:[%s2836_s14 + $0x60] sm:$0xff]   ;;  %p2462_p3 = pneg %p2461_p10  ;;  %p2467_p9 = scmp.lt.s32.totalorder %s2465_s10, %s2459_s0 }
  0xa7   : > { %v2305_v25 = vld [vmem:[%s2836_s14 + $0x50] sm:$0xff]   ;;  %v2324_v26 = vld [vmem:[%s2843_s20 + $0x60] ss:$8 sps:$4 sm:$0xff]   ;;  %v2306_v27 = vld [vmem:[%s2836_s14 + $0x58] sm:$0xff]  }
  0xa8   : > { %1990 = vmatpush3.bf16.msra.mxu0 %v2289_v2  ;;  %v2308_v29 = vld [vmem:[%s2836_s14 + $0x68] sm:$0xff]   ;;  %v2309_v30 = vld [vmem:[%s2836_s14 + $0x70] sm:$0xff]   ;;  %v2310_v31 = vld [vmem:[%s2836_s14 + $0x78] sm:$0xff]   ;;  %p2468_p5 = por %p2467_p9, %p2466_p4 }
  0xa9   : > { %1991 = vmatprep.subr.bf16.mxu0 %v2290_v3  ;;  %v2326_v32 = vld [vmem:[%s2843_s20 + $0x70] ss:$8 sps:$4 sm:$0xff]   ;;  %v2328_v33 = vld [vmem:[%s2843_s20 + $0x14] ss:$8 sps:$4 sm:$0xff]   ;;  %v2329_v34 = vld [vmem:[%s2843_s20 + $0x24] ss:$8 sps:$4 sm:$0xff]  }
  0xaa   : > { %v2330_v35 = vld [vmem:[%s2843_s20 + $0x34] ss:$8 sps:$4 sm:$0xff]   ;;  %v2331_v36 = vld [vmem:[%s2843_s20 + $0x44] ss:$8 sps:$4 sm:$0xff]   ;;  %v2892_v41 = vld [vmem:[%s3057_s3] ss:$0 sm:$0xff]  ;;  %p2469_p7 = pnand %p2468_p5, %p2462_p3 }
  0xab   : > { %2036 = vmatpush3.bf16.xpose.msra.mxu1 %v2314_v10  ;;  %v2332_v37 = vld [vmem:[%s2843_s20 + $0x54] ss:$8 sps:$4 sm:$0xff]   ;;  %v2333_v38 = vld [vmem:[%s2843_s20 + $0x64] ss:$8 sps:$4 sm:$0xff]  }
  0xac   : > { %1992 = vmatpush3.bf16.msra.mxu0 %v2290_v3  ;;  %2037 = vmatprep.subr.bf16.mxu1 %v2316_v14  ;;  %v2334_v39 = vld [vmem:[%s2843_s20 + $0x74] ss:$8 sps:$4 sm:$0xff]  }
  0xad   : > { %1993 = vmatprep.subr.bf16.mxu0 %v2291_v5 }
  0xb0   : > { %1994 = vmatpush3.bf16.msra.mxu0 %v2291_v5 }
  0xb1   : > { %1995 = vmatprep.subr.bf16.mxu0 %v2292_v6 }
  0xb3   : > { %2038 = vmatpush3.bf16.xpose.msra.mxu1 %v2316_v14 }
  0xb4   : > { %1996 = vmatpush3.bf16.msra.mxu0 %v2292_v6  ;;  %2039 = vmatprep.subr.bf16.mxu1 %v2318_v17 }
  0xb5   : > { %1997 = vmatprep.subr.bf16.mxu0 %v2293_v7 }
  0xb8   : > { %1998 = vmatpush3.bf16.msra.mxu0 %v2293_v7 }
  0xb9   : > { %1999 = vmatprep.subr.bf16.mxu0 %v2294_v8 }
  0xbb   : > { %2040 = vmatpush3.bf16.xpose.msra.mxu1 %v2318_v17 }
  0xbc   : > { %2000 = vmatpush3.bf16.msra.mxu0 %v2294_v8  ;;  %2041 = vmatprep.subr.bf16.mxu1 %v2320_v20 }
  0xbd   : > { %2081 = vmatprep.subr.bf16.mxu0 %v2313_v11 }
  0xbf   : > { %2002 = vmatmul.mubr.bf16.vlgmr.msra.gmra.mrb[0].mxu0 %v2296_v12 }
  0xc0   : > { %2005 = vmatprep.mubr.bf16.mxu0 %v2297_v13  ;;  %2082 = vmatpush3.bf16.msra.mxu0 %v2313_v11 }
  0xc1   : > { %2083 = vmatprep.subr.bf16.mxu0 %v2328_v33 }
  0xc3   : > { %2042 = vmatpush3.bf16.xpose.msra.mxu1 %v2320_v20 }
  0xc4   : > { %2043 = vmatprep.subr.bf16.mxu1 %v2322_v23  ;;  %2084 = vmatpush3.bf16.msra.mxu0 %v2328_v33 }
  0xc5   : > { %2085 = vmatprep.subr.bf16.mxu0 %v2329_v34 }
  0xc7   : > { %2006 = vmatmul.mubr.bf16.gmra.mrb[4].mxu0 %v2298_v15 }
  0xc8   : > { %2009 = vmatprep.mubr.bf16.mxu0 %v2299_v16  ;;  %2086 = vmatpush3.bf16.msra.mxu0 %v2329_v34 }
  0xc9   : > { %2087 = vmatprep.subr.bf16.mxu0 %v2330_v35 }
  0xcb   : > { %2044 = vmatpush3.bf16.xpose.msra.mxu1 %v2322_v23 }
  0xcc   : > { %2045 = vmatprep.subr.bf16.mxu1 %v2324_v26  ;;  %2088 = vmatpush3.bf16.msra.mxu0 %v2330_v35 }
  0xcd   : > { %2089 = vmatprep.subr.bf16.mxu0 %v2331_v36 }
  0xcf   : > { %2010 = vmatmul.mubr.bf16.gmra.mrb[8].mxu0 %v2300_v18 }
  0xd0   : > { %2013 = vmatprep.mubr.bf16.mxu0 %v2301_v19  ;;  %2090 = vmatpush3.bf16.msra.mxu0 %v2331_v36 }
  0xd1   : > { %2091 = vmatprep.subr.bf16.mxu0 %v2332_v37 }
  0xd3   : > { %2046 = vmatpush3.bf16.xpose.msra.mxu1 %v2324_v26 }
  0xd4   : > { %2047 = vmatprep.subr.bf16.mxu1 %v2326_v32  ;;  %2092 = vmatpush3.bf16.msra.mxu0 %v2332_v37 }
  0xd5   : > { %2093 = vmatprep.subr.bf16.mxu0 %v2333_v38 }
  0xd7   : > { %2014 = vmatmul.mubr.bf16.gmra.mrb[12].mxu0 %v2302_v21 }
  0xd8   : > { %2017 = vmatprep.mubr.bf16.mxu0 %v2303_v22  ;;  %2094 = vmatpush3.bf16.msra.mxu0 %v2333_v38 }
  0xd9   : > { %2095 = vmatprep.subr.bf16.mxu0 %v2334_v39 }
  0xdb   : > { %2048 = vmatpush3.bf16.xpose.msra.mxu1 %v2326_v32 }
  0xdc   : > { %2096 = vmatpush3.bf16.msra.mxu0 %v2334_v39 }
  0xdf   : > { %2018 = vmatmul.mubr.bf16.gmra.mrb[16].mxu0 %v2304_v24 }
  0xe0   : > { %2021 = vmatprep.mubr.bf16.mxu0 %v2305_v25 }
  0xe7   : > { %2022 = vmatmul.mubr.bf16.gmra.mrb[20].mxu0 %v2306_v27 }
  0xe8   : > { %2025 = vmatprep.mubr.bf16.mxu0 %v2307_v28 }
  0xef   : > { %2026 = vmatmul.mubr.bf16.gmra.mrb[24].mxu0 %v2308_v29 }
  0xf0   : > { %2029 = vmatprep.mubr.bf16.mxu0 %v2309_v30 }
  0xf7   : > { %2030 = vmatmul.mubr.bf16.gmra.mrb[28].mxu0 %v2310_v31 }
 0x192   : > { %v2003_v40 = vpop.f32.mrb[0].mxu0 }
 0x193   : > { %v642_v42 = vpop.f32.mrb[1].mxu0  ;;  %v651_v44 = vadd.f32 %v2003_v40, %v2892_v41 }
 0x194   : > { %v2004_v43 = vpop.f32.mrb[2].mxu0  ;;  %v643_v47 = vadd.f32 %v2892_v41, %v642_v42 }
 0x195   : > { %v654_v45 = vadd.f32 %v2004_v43, %v2892_v41  ;;  %v645_v46 = vpop.f32.mrb[3].mxu0 }
 0x196   : > { %v646_v48 = vadd.f32 %v2892_v41, %v645_v46 }
 0x197   : > { %v770_v49 = vpack.c.bf16 %v654_v45, %v651_v44 }
 0x198   : > { %v769_v50 = vpack.c.bf16 %v646_v48, %v643_v47 }
 0x19a   : > { %v2007_v51 = vpop.f32.mrb[4].mxu0  ;;  %2049 = vmatprep.mubr.bf16.mxu1 %v769_v50 }
 0x19b   : > { %v658_v52 = vpop.f32.mrb[5].mxu0  ;;  %2050 = vmatmul.mubr.bf16.vlgmr.msra.gmra.mrb[0].mxu1 %v770_v49  ;;  %v667_v54 = vadd.f32 %v2007_v51, %v2892_v41 }
 0x19c   : > { %v2008_v53 = vpop.f32.mrb[6].mxu0  ;;  %v659_v57 = vadd.f32 %v2892_v41, %v658_v52 }
 0x19d   : > { %v670_v55 = vadd.f32 %v2008_v53, %v2892_v41  ;;  %v661_v56 = vpop.f32.mrb[7].mxu0 }
 0x19e   : > { %v662_v58 = vadd.f32 %v2892_v41, %v661_v56 }
 0x19f   : > { %v772_v59 = vpack.c.bf16 %v670_v55, %v667_v54 }
 0x1a0   : > { %v771_v60 = vpack.c.bf16 %v662_v58, %v659_v57  ;;  %v2335_v58 = vld [vmem:[#allocation10] sm:$0xff]  }
 0x1a1   : > { %2177 = vmatprep.subr.bf16.mxu1 %v2335_v58  ;;  %2129 = vmatprep.subr.bf16.mxu0 %v2335_v58 }
 0x1a2   : > { %v2011_v61 = vpop.f32.mrb[8].mxu0  ;;  %2053 = vmatprep.mubr.bf16.mxu1 %v771_v60  ;;  %2185 = vmatpush3.bf16.msra.mxu1 %v2335_v58  ;;  %v2337_v60 = vld [vmem:[#allocation10 + $0x10] sm:$0xff]  }
 0x1a3   : > { %v674_v62 = vpop.f32.mrb[9].mxu0  ;;  %2054 = vmatmul.mubr.bf16.gmra.mrb[4].mxu1 %v772_v59  ;;  %v683_v0 = vadd.f32 %v2011_v61, %v2892_v41  ;;  %v2336_v59 = vld [vmem:[#allocation10 + $0x8] sm:$0xff]   ;;  %v2338_v61 = vld [vmem:[#allocation10 + $0x18] sm:$0xff]  }
 0x1a4   : > { %v2012_v63 = vpop.f32.mrb[10].mxu0  ;;  %v675_v3 = vadd.f32 %v2892_v41, %v674_v62  ;;  %2178 = vmatprep.subr.bf16.mxu1 %v2336_v59  ;;  %v2339_v62 = vld [vmem:[#allocation10 + $0x20] sm:$0xff]  }
 0x1a5   : > { %v686_v1 = vadd.f32 %v2012_v63, %v2892_v41  ;;  %v677_v2 = vpop.f32.mrb[11].mxu0  ;;  %v2341_v63 = vld [vmem:[#allocation10 + $0x30] sm:$0xff]  }
 0x1a6   : > { %v678_v4 = vadd.f32 %v2892_v41, %v677_v2  ;;  %2186 = vmatpush3.bf16.msra.mxu1 %v2336_v59 }
 0x1a7   : > { %v774_v5 = vpack.c.bf16 %v686_v1, %v683_v0  ;;  %2179 = vmatprep.subr.bf16.mxu1 %v2337_v60 }
 0x1a8   : > { %v773_v6 = vpack.c.bf16 %v678_v4, %v675_v3 }
 0x1aa   : > { %v2015_v7 = vpop.f32.mrb[12].mxu0  ;;  %2057 = vmatprep.mubr.bf16.mxu1 %v773_v6  ;;  %2187 = vmatpush3.bf16.msra.mxu1 %v2337_v60 }
 0x1ab   : > { %v690_v8 = vpop.f32.mrb[13].mxu0  ;;  %2058 = vmatmul.mubr.bf16.gmra.mrb[8].mxu1 %v774_v5  ;;  %v699_v10 = vadd.f32 %v2015_v7, %v2892_v41  ;;  %2180 = vmatprep.subr.bf16.mxu1 %v2338_v61 }
 0x1ac   : > { %v2016_v9 = vpop.f32.mrb[14].mxu0  ;;  %v691_v13 = vadd.f32 %v2892_v41, %v690_v8 }
 0x1ad   : > { %v702_v11 = vadd.f32 %v2016_v9, %v2892_v41  ;;  %v693_v12 = vpop.f32.mrb[15].mxu0 }
 0x1ae   : > { %v694_v14 = vadd.f32 %v2892_v41, %v693_v12  ;;  %2188 = vmatpush3.bf16.msra.mxu1 %v2338_v61 }
 0x1af   : > { %v776_v15 = vpack.c.bf16 %v702_v11, %v699_v10  ;;  %2181 = vmatprep.subr.bf16.mxu1 %v2339_v62 }
 0x1b0   : > { %v775_v16 = vpack.c.bf16 %v694_v14, %v691_v13 }
 0x1b2   : > { %v2019_v17 = vpop.f32.mrb[16].mxu0  ;;  %2061 = vmatprep.mubr.bf16.mxu1 %v775_v16  ;;  %2189 = vmatpush3.bf16.msra.mxu1 %v2339_v62 }
 0x1b3   : > { %v706_v18 = vpop.f32.mrb[17].mxu0  ;;  %2062 = vmatmul.mubr.bf16.gmra.mrb[12].mxu1 %v776_v15  ;;  %v715_v20 = vadd.f32 %v2019_v17, %v2892_v41 }
 0x1b4   : > { %v2020_v19 = vpop.f32.mrb[18].mxu0  ;;  %v707_v23 = vadd.f32 %v2892_v41, %v706_v18 }
 0x1b5   : > { %v718_v21 = vadd.f32 %v2020_v19, %v2892_v41  ;;  %v709_v22 = vpop.f32.mrb[19].mxu0 }
 0x1b6   : > { %v710_v24 = vadd.f32 %v2892_v41, %v709_v22 }
 0x1b7   : > { %v778_v25 = vpack.c.bf16 %v718_v21, %v715_v20 }
 0x1b8   : > { %v777_v26 = vpack.c.bf16 %v710_v24, %v707_v23 }
 0x1ba   : > { %v2023_v27 = vpop.f32.mrb[20].mxu0  ;;  %2065 = vmatprep.mubr.bf16.mxu1 %v777_v26 }
 0x1bb   : > { %v722_v28 = vpop.f32.mrb[21].mxu0  ;;  %2066 = vmatmul.mubr.bf16.gmra.mrb[16].mxu1 %v778_v25  ;;  %v731_v30 = vadd.f32 %v2023_v27, %v2892_v41 }
 0x1bc   : > { %v2024_v29 = vpop.f32.mrb[22].mxu0  ;;  %v723_v33 = vadd.f32 %v2892_v41, %v722_v28 }
 0x1bd   : > { %v734_v31 = vadd.f32 %v2024_v29, %v2892_v41  ;;  %v725_v32 = vpop.f32.mrb[23].mxu0 }
 0x1be   : > { %v726_v34 = vadd.f32 %v2892_v41, %v725_v32 }
 0x1bf   : > { %v780_v35 = vpack.c.bf16 %v734_v31, %v731_v30 }
 0x1c0   : > { %v779_v36 = vpack.c.bf16 %v726_v34, %v723_v33 }
 0x1c2   : > { %v2027_v37 = vpop.f32.mrb[24].mxu0  ;;  %2069 = vmatprep.mubr.bf16.mxu1 %v779_v36 }
 0x1c3   : > { %v738_v38 = vpop.f32.mrb[25].mxu0  ;;  %2070 = vmatmul.mubr.bf16.gmra.mrb[20].mxu1 %v780_v35  ;;  %v747_v40 = vadd.f32 %v2027_v37, %v2892_v41 }
 0x1c4   : > { %v2028_v39 = vpop.f32.mrb[26].mxu0  ;;  %v739_v44 = vadd.f32 %v2892_v41, %v738_v38 }
 0x1c5   : > { %v750_v42 = vadd.f32 %v2028_v39, %v2892_v41  ;;  %v741_v43 = vpop.f32.mrb[27].mxu0 }
 0x1c6   : > { %v742_v45 = vadd.f32 %v2892_v41, %v741_v43 }
 0x1c7   : > { %v782_v46 = vpack.c.bf16 %v750_v42, %v747_v40 }
 0x1c8   : > { %v781_v47 = vpack.c.bf16 %v742_v45, %v739_v44 }
 0x1ca   : > { %v2031_v48 = vpop.f32.mrb[28].mxu0  ;;  %2073 = vmatprep.mubr.bf16.mxu1 %v781_v47 }
 0x1cb   : > { %v754_v49 = vpop.f32.mrb[29].mxu0  ;;  %2074 = vmatmul.mubr.bf16.gmra.mrb[24].mxu1 %v782_v46  ;;  %v763_v51 = vadd.f32 %v2031_v48, %v2892_v41 }
 0x1cc   : > { %v2032_v50 = vpop.f32.mrb[30].mxu0  ;;  %v755_v54 = vadd.f32 %v2892_v41, %v754_v49  ;;  %v2342_v49 = vld [vmem:[#allocation10 + $0x38] sm:$0xff]  }
 0x1cd   : > { %v766_v52 = vadd.f32 %v2032_v50, %v2892_v41  ;;  %v757_v53 = vpop.f32.mrb[31].mxu0 }
 0x1ce   : > { %v758_v55 = vadd.f32 %v2892_v41, %v757_v53  ;;  %v2340_v41 = vld [vmem:[#allocation10 + $0x28] sm:$0xff]  }
 0x1cf   : > { %v784_v56 = vpack.c.bf16 %v766_v52, %v763_v51  ;;  %2182 = vmatprep.subr.bf16.mxu1 %v2340_v41 }
 0x1d0   : > { %v783_v57 = vpack.c.bf16 %v758_v55, %v755_v54  ;;  %2190 = vmatpush3.bf16.msra.mxu1 %v2340_v41 }
 0x1d1   : > { %2183 = vmatprep.subr.bf16.mxu1 %v2341_v63 }
 0x1d2   : > { %2077 = vmatprep.mubr.bf16.mxu1 %v783_v57 }
 0x1d3   : > { %2078 = vmatmul.mubr.bf16.gmra.mrb[28].mxu1 %v784_v56 }
 0x1d4   : > { %2191 = vmatpush3.bf16.msra.mxu1 %v2341_v63 }
 0x1d5   : > { %2184 = vmatprep.subr.bf16.mxu1 %v2342_v49 }
 0x1d8   : > { %2192 = vmatpush3.bf16.msra.mxu1 %v2342_v49 }
 0x26e   : > { %v2051_v0 = vpop.f32.mrb[0].mxu1 }
 0x26f   : > { %v915_v1 = vpop.f32.mrb[1].mxu1 }
 0x270   : > { %v2052_v2 = vpop.f32.mrb[2].mxu1 }
 0x271   : > { %v1075_v3 = vpack.c.bf16 %v2052_v2, %v2051_v0  ;;  %v918_v4 = vpop.f32.mrb[3].mxu1 }
 0x272   : > { %v1074_v5 = vpack.c.bf16 %v918_v4, %v915_v1 }
 0x274   : > { %2097 = vmatprep.mubr.bf16.mxu0 %v1074_v5 }
 0x275   : > { %2098 = vmatmul.mubr.bf16.vlgmr.msra.gmra.mrb[32].mxu0 %v1075_v3 }
 0x276   : > { %v2055_v6 = vpop.f32.mrb[4].mxu1  ;;  %2130 = vmatpush3.bf16.msra.mxu0 %v2335_v58 }
 0x277   : > { %v931_v7 = vpop.f32.mrb[5].mxu1  ;;  %2131 = vmatprep.subr.bf16.mxu0 %v2336_v59 }
 0x278   : > { %v2056_v8 = vpop.f32.mrb[6].mxu1 }
 0x279   : > { %v1077_v9 = vpack.c.bf16 %v2056_v8, %v2055_v6  ;;  %v934_v10 = vpop.f32.mrb[7].mxu1 }
 0x27a   : > { %v1076_v11 = vpack.c.bf16 %v934_v10, %v931_v7  ;;  %2132 = vmatpush3.bf16.msra.mxu0 %v2336_v59 }
 0x27b   : > { %2133 = vmatprep.subr.bf16.mxu0 %v2337_v60 }
 0x27c   : > { %2101 = vmatprep.mubr.bf16.mxu0 %v1076_v11 }
 0x27d   : > { %2102 = vmatmul.mubr.bf16.gmra.mrb[36].mxu0 %v1077_v9 }
 0x27e   : > { %v2059_v12 = vpop.f32.mrb[8].mxu1  ;;  %2134 = vmatpush3.bf16.msra.mxu0 %v2337_v60 }
 0x27f   : > { %v947_v13 = vpop.f32.mrb[9].mxu1  ;;  %2135 = vmatprep.subr.bf16.mxu0 %v2338_v61 }
 0x280   : > { %v2060_v14 = vpop.f32.mrb[10].mxu1 }
 0x281   : > { %v1079_v15 = vpack.c.bf16 %v2060_v14, %v2059_v12  ;;  %v950_v16 = vpop.f32.mrb[11].mxu1 }
 0x282   : > { %v1078_v17 = vpack.c.bf16 %v950_v16, %v947_v13  ;;  %2136 = vmatpush3.bf16.msra.mxu0 %v2338_v61 }
 0x283   : > { %2137 = vmatprep.subr.bf16.mxu0 %v2339_v62 }
 0x284   : > { %2105 = vmatprep.mubr.bf16.mxu0 %v1078_v17 }
 0x285   : > { %2106 = vmatmul.mubr.bf16.gmra.mrb[40].mxu0 %v1079_v15 }
 0x286   : > { %v2063_v18 = vpop.f32.mrb[12].mxu1  ;;  %2138 = vmatpush3.bf16.msra.mxu0 %v2339_v62 }
 0x287   : > { %v963_v19 = vpop.f32.mrb[13].mxu1  ;;  %2139 = vmatprep.subr.bf16.mxu0 %v2340_v41 }
 0x288   : > { %v2064_v20 = vpop.f32.mrb[14].mxu1 }
 0x289   : > { %v1081_v21 = vpack.c.bf16 %v2064_v20, %v2063_v18  ;;  %v966_v22 = vpop.f32.mrb[15].mxu1 }
 0x28a   : > { %v1080_v23 = vpack.c.bf16 %v966_v22, %v963_v19  ;;  %2140 = vmatpush3.bf16.msra.mxu0 %v2340_v41 }
 0x28b   : > { %2141 = vmatprep.subr.bf16.mxu0 %v2341_v63 }
 0x28c   : > { %2109 = vmatprep.mubr.bf16.mxu0 %v1080_v23 }
 0x28d   : > { %2110 = vmatmul.mubr.bf16.gmra.mrb[44].mxu0 %v1081_v21 }
 0x28e   : > { %v2067_v24 = vpop.f32.mrb[16].mxu1  ;;  %2142 = vmatpush3.bf16.msra.mxu0 %v2341_v63 }
 0x28f   : > { %v979_v25 = vpop.f32.mrb[17].mxu1  ;;  %2143 = vmatprep.subr.bf16.mxu0 %v2342_v49 }
 0x290   : > { %v2068_v26 = vpop.f32.mrb[18].mxu1 }
 0x291   : > { %v1083_v27 = vpack.c.bf16 %v2068_v26, %v2067_v24  ;;  %v982_v28 = vpop.f32.mrb[19].mxu1 }
 0x292   : > { %v1082_v29 = vpack.c.bf16 %v982_v28, %v979_v25  ;;  %2144 = vmatpush3.bf16.msra.mxu0 %v2342_v49 }
 0x294   : > { %2113 = vmatprep.mubr.bf16.mxu0 %v1082_v29 }
 0x295   : > { %2114 = vmatmul.mubr.bf16.gmra.mrb[48].mxu0 %v1083_v27 }
 0x296   : > { %v2071_v30 = vpop.f32.mrb[20].mxu1 }
 0x297   : > { %v995_v31 = vpop.f32.mrb[21].mxu1 }
 0x298   : > { %v2072_v32 = vpop.f32.mrb[22].mxu1 }
 0x299   : > { %v1085_v33 = vpack.c.bf16 %v2072_v32, %v2071_v30  ;;  %v998_v34 = vpop.f32.mrb[23].mxu1 }
 0x29a   : > { %v1084_v35 = vpack.c.bf16 %v998_v34, %v995_v31 }
 0x29c   : > { %2117 = vmatprep.mubr.bf16.mxu0 %v1084_v35 }
 0x29d   : > { %2118 = vmatmul.mubr.bf16.gmra.mrb[52].mxu0 %v1085_v33  ;;  %v2930_v33 = vld [vmem:[%s3059_s5] ss:$0 sm:$0xff] }
 0x29e   : > { %v2075_v36 = vpop.f32.mrb[24].mxu1 }
 0x29f   : > { %v1011_v37 = vpop.f32.mrb[25].mxu1 }
 0x2a0   : > { %v2076_v38 = vpop.f32.mrb[26].mxu1 }
 0x2a1   : > { %v1087_v39 = vpack.c.bf16 %v2076_v38, %v2075_v36  ;;  %v1014_v40 = vpop.f32.mrb[27].mxu1 }
 0x2a2   : > { %v1086_v42 = vpack.c.bf16 %v1014_v40, %v1011_v37 }
 0x2a4   : > { %2121 = vmatprep.mubr.bf16.mxu0 %v1086_v42 }
 0x2a5   : > { %2122 = vmatmul.mubr.bf16.gmra.mrb[56].mxu0 %v1087_v39 }
 0x2a6   : > { %v2079_v43 = vpop.f32.mrb[28].mxu1 }
 0x2a7   : > { %v1027_v44 = vpop.f32.mrb[29].mxu1 }
 0x2a8   : > { %v2080_v45 = vpop.f32.mrb[30].mxu1 }
 0x2a9   : > { %v1089_v46 = vpack.c.bf16 %v2080_v45, %v2079_v43  ;;  %v1030_v47 = vpop.f32.mrb[31].mxu1 }
 0x2aa   : > { %v1088_v48 = vpack.c.bf16 %v1030_v47, %v1027_v44 }
 0x2ac   : > { %2125 = vmatprep.mubr.bf16.mxu0 %v1088_v48 }
 0x2ad   : > { %2126 = vmatmul.mubr.bf16.gmra.mrb[60].mxu0 %v1089_v46 }
 0x348   : > { %v2099_v50 = vpop.f32.mrb[32].mxu0 }
 0x349   : > { %v1156_v51 = vpop.f32.mrb[33].mxu0 }
 0x34a   : > { %v2100_v52 = vpop.f32.mrb[34].mxu0 }
 0x34b   : > { %v1383_v53 = vpack.c.bf16 %v2100_v52, %v2099_v50  ;;  %v1159_v54 = vpop.f32.mrb[35].mxu0 }
 0x34c   : > { %v1382_v55 = vpack.c.bf16 %v1159_v54, %v1156_v51 }
 0x34e   : > { %2145 = vmatprep.mubr.bf16.mxu0 %v1382_v55 }
 0x34f   : > { %2146 = vmatmul.mubr.bf16.vlgmr.msra.gmra.mrb[64].mxu0 %v1383_v53 }
 0x350   : > { %v2103_v56 = vpop.f32.mrb[36].mxu0 }
 0x351   : > { %v1172_v57 = vpop.f32.mrb[37].mxu0 }
 0x352   : > { %v2104_v58 = vpop.f32.mrb[38].mxu0 }
 0x353   : > { %v1385_v59 = vpack.c.bf16 %v2104_v58, %v2103_v56  ;;  %v1175_v60 = vpop.f32.mrb[39].mxu0 }
 0x354   : > { %v1384_v61 = vpack.c.bf16 %v1175_v60, %v1172_v57 }
 0x356   : > { %2149 = vmatprep.mubr.bf16.mxu0 %v1384_v61 }
 0x357   : > { %2150 = vmatmul.mubr.bf16.gmra.mrb[68].mxu0 %v1385_v59 }
 0x358   : > { %v2107_v62 = vpop.f32.mrb[40].mxu0 }
 0x359   : > { %v1188_v41 = vpop.f32.mrb[41].mxu0 }
 0x35a   : > { %v2108_v63 = vpop.f32.mrb[42].mxu0 }
 0x35b   : > { %v1387_v0 = vpack.c.bf16 %v2108_v63, %v2107_v62  ;;  %v1191_v1 = vpop.f32.mrb[43].mxu0 }
 0x35c   : > { %v1386_v2 = vpack.c.bf16 %v1191_v1, %v1188_v41 }
 0x35e   : > { %2153 = vmatprep.mubr.bf16.mxu1 %v1386_v2 }
 0x35f   : > { %2154 = vmatmul.mubr.bf16.vlgmr.msra.gmra.mrb[32].mxu1 %v1387_v0 }
 0x360   : > { %v2111_v3 = vpop.f32.mrb[44].mxu0 }
 0x361   : > { %v1204_v4 = vpop.f32.mrb[45].mxu0 }
 0x362   : > { %v2112_v5 = vpop.f32.mrb[46].mxu0 }
 0x363   : > { %v1389_v6 = vpack.c.bf16 %v2112_v5, %v2111_v3  ;;  %v1207_v7 = vpop.f32.mrb[47].mxu0 }
 0x364   : > { %v1388_v8 = vpack.c.bf16 %v1207_v7, %v1204_v4 }
 0x366   : > { %2157 = vmatprep.mubr.bf16.mxu1 %v1388_v8 }
 0x367   : > { %2158 = vmatmul.mubr.bf16.gmra.mrb[36].mxu1 %v1389_v6 }
 0x368   : > { %v2115_v9 = vpop.f32.mrb[48].mxu0 }
 0x369   : > { %v1220_v10 = vpop.f32.mrb[49].mxu0 }
 0x36a   : > { %v2116_v11 = vpop.f32.mrb[50].mxu0 }
 0x36b   : > { %v1391_v12 = vpack.c.bf16 %v2116_v11, %v2115_v9  ;;  %v1223_v13 = vpop.f32.mrb[51].mxu0 }
 0x36c   : > { %v1390_v14 = vpack.c.bf16 %v1223_v13, %v1220_v10 }
 0x36e   : > { %2161 = vmatprep.mubr.bf16.mxu1 %v1390_v14 }
 0x36f   : > { %2162 = vmatmul.mubr.bf16.gmra.mrb[40].mxu1 %v1391_v12 }
 0x370   : > { %v2119_v15 = vpop.f32.mrb[52].mxu0 }
 0x371   : > { %v1236_v16 = vpop.f32.mrb[53].mxu0 }
 0x372   : > { %v2120_v17 = vpop.f32.mrb[54].mxu0 }
 0x373   : > { %v1393_v18 = vpack.c.bf16 %v2120_v17, %v2119_v15  ;;  %v1239_v19 = vpop.f32.mrb[55].mxu0 }
 0x374   : > { %v1392_v20 = vpack.c.bf16 %v1239_v19, %v1236_v16 }
 0x376   : > { %2165 = vmatprep.mubr.bf16.mxu1 %v1392_v20 }
 0x377   : > { %2166 = vmatmul.mubr.bf16.gmra.mrb[44].mxu1 %v1393_v18 }
 0x378   : > { %v2123_v21 = vpop.f32.mrb[56].mxu0 }
 0x379   : > { %v1252_v22 = vpop.f32.mrb[57].mxu0 }
 0x37a   : > { %v2124_v23 = vpop.f32.mrb[58].mxu0 }
 0x37b   : > { %v1395_v24 = vpack.c.bf16 %v2124_v23, %v2123_v21  ;;  %v1255_v25 = vpop.f32.mrb[59].mxu0 }
 0x37c   : > { %v1394_v26 = vpack.c.bf16 %v1255_v25, %v1252_v22 }
 0x37e   : > { %2169 = vmatprep.mubr.bf16.mxu1 %v1394_v26 }
 0x37f   : > { %2170 = vmatmul.mubr.bf16.gmra.mrb[48].mxu1 %v1395_v24 }
 0x380   : > { %v2127_v27 = vpop.f32.mrb[60].mxu0 }
 0x381   : > { %v1268_v28 = vpop.f32.mrb[61].mxu0 }
 0x382   : > { %v2128_v29 = vpop.f32.mrb[62].mxu0 }
 0x383   : > { %v1397_v30 = vpack.c.bf16 %v2128_v29, %v2127_v27  ;;  %v1271_v31 = vpop.f32.mrb[63].mxu0 }
 0x384   : > { %v1396_v32 = vpack.c.bf16 %v1271_v31, %v1268_v28 }
 0x386   : > { %2173 = vmatprep.mubr.bf16.mxu1 %v1396_v32 }
 0x387   : > { %2174 = vmatmul.mubr.bf16.gmra.mrb[52].mxu1 %v1397_v30 }
 0x422   : > { %v2147_v34 = vpop.f32.mrb[64].mxu0 }
 0x423   : > { %v1512_v35 = vadd.f32 %v2147_v34, %v2930_v33  ;;  %v1503_v36 = vpop.f32.mrb[65].mxu0 }
 0x424   : > { %v1504_v37 = vadd.f32 %v2930_v33, %v1503_v36  ;;  %v2148_v38 = vpop.f32.mrb[66].mxu0 }
 0x425   : > { %1632 = vst [vmem:[%s2934_s4 + $0x10] sm:$0xff] %v1512_v35  ;;  %v1515_v39 = vadd.f32 %v2148_v38, %v2930_v33  ;;  %v1506_v40 = vpop.f32.mrb[67].mxu0 }
 0x426   : > { %1630 = vst [vmem:[%s2934_s4] sm:$0xff] %v1504_v37  ;;  %v1507_v42 = vadd.f32 %v2930_v33, %v1506_v40 }
 0x427   : > { %1633 = vst [vmem:[%s2934_s4 + $0x18] sm:$0xff] %v1515_v39 }
 0x428   : > { %1631 = vst [vmem:[%s2934_s4 + $0x8] sm:$0xff] %v1507_v42 }
 0x42a   : > { %v2151_v43 = vpop.f32.mrb[68].mxu0 }
 0x42b   : > { %v1528_v44 = vadd.f32 %v2151_v43, %v2930_v33  ;;  %v1519_v45 = vpop.f32.mrb[69].mxu0 }
 0x42c   : > { %v1520_v46 = vadd.f32 %v2930_v33, %v1519_v45  ;;  %v2152_v47 = vpop.f32.mrb[70].mxu0 }
 0x42d   : > { %1636 = vst [vmem:[%s2934_s4 + $0x30] sm:$0xff] %v1528_v44  ;;  %v1531_v48 = vadd.f32 %v2152_v47, %v2930_v33  ;;  %v1522_v49 = vpop.f32.mrb[71].mxu0 }
 0x42e   : > { %1634 = vst [vmem:[%s2934_s4 + $0x20] sm:$0xff] %v1520_v46  ;;  %v1523_v50 = vadd.f32 %v2930_v33, %v1522_v49 }
 0x42f   : > { %1637 = vst [vmem:[%s2934_s4 + $0x38] sm:$0xff] %v1531_v48 }
 0x430   : > { %1635 = vst [vmem:[%s2934_s4 + $0x28] sm:$0xff] %v1523_v50 }
 0x432   : > { %v2155_v51 = vpop.f32.mrb[32].mxu1 }
 0x433   : > { %v1544_v52 = vadd.f32 %v2155_v51, %v2930_v33  ;;  %v1535_v53 = vpop.f32.mrb[33].mxu1 }
 0x434   : > { %v1536_v54 = vadd.f32 %v2930_v33, %v1535_v53  ;;  %v2156_v55 = vpop.f32.mrb[34].mxu1 }
 0x435   : > { %1640 = vst [vmem:[%s2934_s4 + $0x50] sm:$0xff] %v1544_v52  ;;  %v1547_v56 = vadd.f32 %v2156_v55, %v2930_v33  ;;  %v1538_v57 = vpop.f32.mrb[35].mxu1 }
 0x436   : > { %1638 = vst [vmem:[%s2934_s4 + $0x40] sm:$0xff] %v1536_v54  ;;  %v1539_v58 = vadd.f32 %v2930_v33, %v1538_v57 }
 0x437   : > { %1641 = vst [vmem:[%s2934_s4 + $0x58] sm:$0xff] %v1547_v56 }
 0x438   : > { %1639 = vst [vmem:[%s2934_s4 + $0x48] sm:$0xff] %v1539_v58 }
 0x43a   : > { %v2159_v59 = vpop.f32.mrb[36].mxu1 }
 0x43b   : > { %v1560_v60 = vadd.f32 %v2159_v59, %v2930_v33  ;;  %v1551_v61 = vpop.f32.mrb[37].mxu1 }
 0x43c   : > { %v1552_v62 = vadd.f32 %v2930_v33, %v1551_v61  ;;  %v2160_v41 = vpop.f32.mrb[38].mxu1 }
 0x43d   : > { %1644 = vst [vmem:[%s2934_s4 + $0x70] sm:$0xff] %v1560_v60  ;;  %v1563_v63 = vadd.f32 %v2160_v41, %v2930_v33  ;;  %v1554_v0 = vpop.f32.mrb[39].mxu1 }
 0x43e   : > { %1642 = vst [vmem:[%s2934_s4 + $0x60] sm:$0xff] %v1552_v62  ;;  %v1555_v1 = vadd.f32 %v2930_v33, %v1554_v0 }
 0x43f   : > { %1645 = vst [vmem:[%s2934_s4 + $0x78] sm:$0xff] %v1563_v63 }
 0x440   : > { %1643 = vst [vmem:[%s2934_s4 + $0x68] sm:$0xff] %v1555_v1 }
 0x442   : > { %v2163_v2 = vpop.f32.mrb[40].mxu1 }
 0x443   : > { %v1576_v3 = vadd.f32 %v2163_v2, %v2930_v33  ;;  %v1567_v4 = vpop.f32.mrb[41].mxu1 }
 0x444   : > { %v1568_v5 = vadd.f32 %v2930_v33, %v1567_v4  ;;  %v2164_v6 = vpop.f32.mrb[42].mxu1 }
 0x445   : > { %1648 = vst [vmem:[%s2934_s4 + $0x90] sm:$0xff] %v1576_v3  ;;  %v1579_v7 = vadd.f32 %v2164_v6, %v2930_v33  ;;  %v1570_v8 = vpop.f32.mrb[43].mxu1 }
 0x446   : > { %1646 = vst [vmem:[%s2934_s4 + $0x80] sm:$0xff] %v1568_v5  ;;  %v1571_v9 = vadd.f32 %v2930_v33, %v1570_v8 }
 0x447   : > { %1649 = vst [vmem:[%s2934_s4 + $0x98] sm:$0xff] %v1579_v7 }
 0x448   : > { %1647 = vst [vmem:[%s2934_s4 + $0x88] sm:$0xff] %v1571_v9 }
 0x44a   : > { %v2167_v10 = vpop.f32.mrb[44].mxu1 }
 0x44b   : > { %v1592_v11 = vadd.f32 %v2167_v10, %v2930_v33  ;;  %v1583_v12 = vpop.f32.mrb[45].mxu1 }
 0x44c   : > { %v1584_v13 = vadd.f32 %v2930_v33, %v1583_v12  ;;  %v2168_v14 = vpop.f32.mrb[46].mxu1 }
 0x44d   : > { %1652 = vst [vmem:[%s2934_s4 + $0xb0] sm:$0xff] %v1592_v11  ;;  %v1595_v15 = vadd.f32 %v2168_v14, %v2930_v33  ;;  %v1586_v16 = vpop.f32.mrb[47].mxu1 }
 0x44e   : > { %1650 = vst [vmem:[%s2934_s4 + $0xa0] sm:$0xff] %v1584_v13  ;;  %v1587_v17 = vadd.f32 %v2930_v33, %v1586_v16 }
 0x44f   : > { %1653 = vst [vmem:[%s2934_s4 + $0xb8] sm:$0xff] %v1595_v15 }
 0x450   : > { %1651 = vst [vmem:[%s2934_s4 + $0xa8] sm:$0xff] %v1587_v17 }
 0x452   : > { %v2171_v18 = vpop.f32.mrb[48].mxu1 }
 0x453   : > { %v1608_v19 = vadd.f32 %v2171_v18, %v2930_v33  ;;  %v1599_v20 = vpop.f32.mrb[49].mxu1 }
 0x454   : > { %v1600_v21 = vadd.f32 %v2930_v33, %v1599_v20  ;;  %v2172_v22 = vpop.f32.mrb[50].mxu1 }
 0x455   : > { %1656 = vst [vmem:[%s2934_s4 + $0xd0] sm:$0xff] %v1608_v19  ;;  %v1611_v23 = vadd.f32 %v2172_v22, %v2930_v33  ;;  %v1602_v24 = vpop.f32.mrb[51].mxu1 }
 0x456   : > { %1654 = vst [vmem:[%s2934_s4 + $0xc0] sm:$0xff] %v1600_v21  ;;  %v1603_v25 = vadd.f32 %v2930_v33, %v1602_v24 }
 0x457   : > { %1657 = vst [vmem:[%s2934_s4 + $0xd8] sm:$0xff] %v1611_v23 }
 0x458   : > { %1655 = vst [vmem:[%s2934_s4 + $0xc8] sm:$0xff] %v1603_v25 }
 0x45a   : > { %v2175_v26 = vpop.f32.mrb[52].mxu1 }
 0x45b   : > { %v1624_v27 = vadd.f32 %v2175_v26, %v2930_v33  ;;  %v1615_v28 = vpop.f32.mrb[53].mxu1 }
 0x45c   : > { %v1616_v29 = vadd.f32 %v2930_v33, %v1615_v28  ;;  %v2176_v30 = vpop.f32.mrb[54].mxu1 }
 0x45d   : > { %1660 = vst [vmem:[%s2934_s4 + $0xf0] sm:$0xff] %v1624_v27  ;;  %v1627_v31 = vadd.f32 %v2176_v30, %v2930_v33  ;;  %v1618_v32 = vpop.f32.mrb[55].mxu1 }
 0x45e   : > { %1658 = vst [vmem:[%s2934_s4 + $0xe0] sm:$0xff] %v1616_v29  ;;  %v1619_v34 = vadd.f32 %v2930_v33, %v1618_v32 }
 0x45f   : > { %1661 = vst [vmem:[%s2934_s4 + $0xf8] sm:$0xff] %v1627_v31 }
 0x460   : > { %1659 = vst [vmem:[%s2934_s4 + $0xe8] sm:$0xff] %v1619_v34 }
 0x461   : > { %2472 = shalt.err (!%p2469_p7)
}
 0x462   : > { %s2473_s18 = scalar_lea.hbm %s2999_s11, 4096  ;;  %s2477_s7 = scalar_lea.hbm %s3060_s6, 8192 }
 0x463   : > { %p2474_p12 = scmp.ne.s32.totalorder %s2999_s11, %s2473_s18  ;;  %p2478_p11 = scmp.lt.u32.totalorder %s2999_s11, %s3060_s6 }
 0x464   : > { %p2479_p13 = scmp.lt.u32.totalorder %s2477_s7, %s2473_s18  ;;  %p2481_p2 = scmp.lt.u32.totalorder %s2473_s18, %s2999_s11 }
 0x465   : > { %p2475_p1 = pnand %p2474_p12, %p3093_p6 }
 0x466   : > { %p2480_p0 = por %p2479_p13, %p2478_p11 }
 0x467   : > { %p2476_p8 = pneg %p2475_p1 }
 0x468   : > { %p2482_p10 = por %p2481_p2, %p2480_p0 }
 0x46a   : > { %p2483_p3 = pnand %p2482_p10, %p2476_p8 }
 0x46c   : > { %2486 = shalt.err (!%p2483_p3)
}
 0x46d   : > { %s2564_s29 = smov 128   ;;  %s2565_s19 = smov 8  }
 0x46e   : > { %2205 = dma.vmem_to_hbm [thread:$0]  (%p3093_p6), %s3001_s25, 4096, %s2999_s11, %s1663_s24, %s2564_s29, %s2564_s29, %s2565_s19  }
 0x46f PF: > { %s1693_s13 = sand.u32 1, %s2533_s21   ;;  %p3094_p4 = scmp.ne.s32.totalorder %s3075_s30, 0 }
 0x470   : > { %p3095_p9 = scmp.ge.s32.totalorder %s2553_s26, 2  ;;  %s1694_s8 = scalar_lea.sflag [#allocation6], %s1693_s13 }
 0x472   : > { %p2222_p5 = pnand %p3095_p9, %p3094_p4 }
 0x474   : > { %2528 = dma.done.wait (!%p2222_p5), %s1694_s8, 4096  }
 0x475   : > { %2530 = vsyncadd (!%p2222_p5), %s1694_s8, 4294963200  ;;  %s26_s26 = sadd.s32 1, %s2553_s26   ;;  %s3096_s4 = sld [smem:[#allocation18_spill]] }
 0x476   : > { %p23_p7 = scmp.ge.s32.totalorder %s26_s26, 4   ;;  %s3097_s23 = sld [smem:[#allocation21_spill]] }
 0x477   : > { %s3098_s24 = sld [smem:[#allocation19_spill]]  ;;  %s3099_s25 = sld [smem:[#allocation20_spill]] }
 0x478   : > { %s3100_s21 = smov %s2537_s22  ;;  %25 = sbr.rel (!%p23_p7) target bundleno = 13 (0xd), region = 118 }
 0x47b   : > { %s3101_s22 = smov %s3096_s4 }
 0x47f   :  { %1699 = vsyncpa [#allocation5], 1 }
 0x480   :  { %1701 = vsyncpa [#allocation5 + $0x1], 1 }
 0x481   :  { %1702 = vsyncpa [#allocation8], 1 }
 0x482   :  { %1704 = vsyncpa [#allocation8 + $0x1], 1 }
 0x483   :  { %1705 = vsyncpa [#allocation11], 1 }
 0x484   :  { %1706 = vsyncpa [#allocation6], 1 }
 0x485   :  { %1708 = vsyncpa [#allocation6 + $0x1], 1 }

</bundles_post_ra>
